<compile_context>
chip_gen: v5e
topology: v5e:2x2
jax: 0.10.0
libtpu: 0.0.40
codegen_flags: <defaults>
</compile_context>

<pallas_src>
import jax
import jax.numpy as jnp
from jax.experimental import pallas as pl
from jax.experimental.pallas import tpu as pltpu


_LANES = 128
_SUBLANES = 8
_NCORES = 2                     # leading "parallel" grid axis (v7x: 2 TCs/chip)
_TARGET_BLOCK_BYTES = 1 << 20   # ~1 MiB per input block per pipeline buffer
_MAX_BLOCK_ROWS = 4096


def _round_up(x, m):
    return ((x + m - 1) // m) * m


def _cdiv(a, b):
    return -(-a // b)


def _make_rubi_bce_kernel(B, C, tile_b, needs_mask):
    """Kernel for one (core, step) grid point.

    Reads a (tile_b, C) row-block of each input straight from its natural
    (B, C) layout, computes numerically stable elementwise BCE-with-logits for
    both heads, masks rows >= B (partial / phantom boundary blocks), and folds
    the block into a per-core (1, 1, C) f32 accumulator that stays resident in
    the output across the 'arbitrary' grid axis.
    """

    def kernel(logits_q_ref, logits_rubi_ref, labels_ref,
               acc_q_ref, acc_rubi_ref):
        c = pl.program_id(0)
        s = pl.program_id(1)

        @pl.when(s == 0)
        def _init():
            acc_q_ref[...] = jnp.zeros_like(acc_q_ref)
            acc_rubi_ref[...] = jnp.zeros_like(acc_rubi_ref)

        y = labels_ref[...].astype(jnp.float32)

        if needs_mask:
            # Global row index of this block.  Phantom trailing blocks (whose
            # DMA the index_map clamps onto the last real block) get
            # row_start >= B and are fully masked -> contribute exactly zero.
            row_start = (c * pl.num_programs(1) + s) * tile_b
            rows = row_start + jax.lax.broadcasted_iota(
                jnp.int32, (tile_b, 1), 0)
            valid = rows < B
        else:
            valid = None

        def bce_block_sum(x_ref):
            x = x_ref[...].astype(jnp.float32)
            # Numerically stable BCE-with-logits (PyTorch formulation):
            #   max(x, 0) - x*y + log1p(exp(-|x|))
            ew = jnp.maximum(x, 0.0) - x * y + jnp.log1p(jnp.exp(-jnp.abs(x)))
            if valid is not None:
                ew = jnp.where(valid, ew, 0.0)
            # Sublane reduce (XLU slot) is hidden under the HBM stream; the
            # final cross-lane reduce happens once, outside the kernel.
            return jnp.sum(ew, axis=0, keepdims=True).reshape(1, 1, C)

        acc_q_ref[...] += bce_block_sum(logits_q_ref)
        acc_rubi_ref[...] += bce_block_sum(logits_rubi_ref)

    return kernel


def _bce_sums_pallas(logits_q, logits_rubi, labels, block_rows=None):
    """Returns (sum_q, sum_rubi): total elementwise BCE-with-logits sums."""
    B, C = labels.shape

    itemsize = max(jnp.dtype(logits_q.dtype).itemsize,
                   jnp.dtype(logits_rubi.dtype).itemsize,
                   jnp.dtype(labels.dtype).itemsize)
    lane_c = _round_up(C, _LANES)   # lane-padded width occupied in VMEM

    if block_rows is None:
        # ~1 MiB per input block: 3 inputs x 2 pipeline buffers ~= 6 MiB VMEM.
        # TODO(synk): for extremely wide C (>~32k classes) also tile the class
        # axis; RUBi's answer vocabularies (~3k) are far below that.
        block_rows = _TARGET_BLOCK_BYTES // (lane_c * itemsize)
    block_rows = max(_SUBLANES, min(_MAX_BLOCK_ROWS,
                                    (block_rows // _SUBLANES) * _SUBLANES))

    if block_rows >= B:
        # Whole problem fits in one block: single grid step, no masking.
        ncores, tile_b, steps, needs_mask = 1, B, 1, False
        total_blocks = 1
    else:
        ncores = _NCORES
        tile_b = block_rows                      # multiple of 8 by construction
        total_blocks = _cdiv(B, tile_b)
        steps = _cdiv(total_blocks, ncores)
        needs_mask = (ncores * steps * tile_b) != B

    last_block = total_blocks - 1

    def in_map(c, s):
        # Clamp phantom trailing blocks (when total_blocks isn't a multiple of
        # ncores) onto the last real block; their contribution is masked to 0
        # inside the kernel, so no double counting occurs.
        return (jnp.minimum(c * steps + s, last_block), 0)

    in_spec = pl.BlockSpec((tile_b, C), in_map)
    acc_spec = pl.BlockSpec((1, 1, C), lambda c, s: (c, 0, 0))

    acc_q, acc_rubi = pl.pallas_call(
        _make_rubi_bce_kernel(B, C, tile_b, needs_mask),
        out_shape=(
            jax.ShapeDtypeStruct((ncores, 1, C), jnp.float32),
            jax.ShapeDtypeStruct((ncores, 1, C), jnp.float32),
        ),
        grid_spec=pltpu.PrefetchScalarGridSpec(
            num_scalar_prefetch=0,
            grid=(ncores, steps),
            in_specs=[in_spec, in_spec, in_spec],
            out_specs=(acc_spec, acc_spec),
        ),
        compiler_params=pltpu.CompilerParams(
            dimension_semantics=("parallel", "arbitrary")),
    )(logits_q, logits_rubi, labels)

    # Tiny (ncores, 1, C) arrays — single cross-lane reduce in plain JAX.
    return jnp.sum(acc_q), jnp.sum(acc_rubi)


def rubi_criterion(net_out, labels, question_loss_weight=1.0,
                   use_pallas=None, block_rows=None):
    logits_q = net_out["logits_q"]
    logits_rubi = net_out["logits_rubi"]
    B, C = labels.shape
    total = B * C

    if use_pallas is None:
        # Tiny problems: the fixed pallas_call launch/pipeline cost dominates;
        # let XLA's fused elementwise+reduce handle them.
        use_pallas = total >= 32768

    if use_pallas:
        sum_q, sum_rubi = _bce_sums_pallas(logits_q, logits_rubi, labels,
                                           block_rows=block_rows)
    else:
        def bce_sum(x, y):
            x = x.astype(jnp.float32)
            y = y.astype(jnp.float32)
            return jnp.sum(jnp.maximum(x, 0.0) - x * y
                           + jnp.log1p(jnp.exp(-jnp.abs(x))))
        sum_q = bce_sum(logits_q, labels)
        sum_rubi = bce_sum(logits_rubi, labels)

    # BCEWithLogitsLoss default reduction is 'mean' over all B*C elements,
    # then the module scales by labels.size(1) == C.
    n_elem = jnp.float32(total)
    fusion_loss = jnp.float32(C) * (sum_rubi / n_elem)
    question_loss = jnp.float32(C) * (sum_q / n_elem)
    loss = fusion_loss + jnp.float32(question_loss_weight) * question_loss
    return {"loss": loss, "loss_rubi": fusion_loss, "loss_q": question_loss}


def _reference(net_out, labels, question_loss_weight=1.0):
    """Pure-JAX reference mirroring torch.nn.BCEWithLogitsLoss semantics."""
    def bce_mean(x, y):
        x = x.astype(jnp.float32)
        y = y.astype(jnp.float32)
        return jnp.mean(jnp.maximum(x, 0.0) - x * y
                        + jnp.log1p(jnp.exp(-jnp.abs(x))))

    C = labels.shape[1]
    fusion_loss = C * bce_mean(net_out["logits_rubi"], labels)
    question_loss = C * bce_mean(net_out["logits_q"], labels)
    loss = fusion_loss + question_loss_weight * question_loss
    return {"loss": loss, "loss_rubi": fusion_loss, "loss_q": question_loss}


if __name__ == "__main__":
    # No learnable parameters in this module; question_loss_weight is a
    # deterministic hyperparameter.
    key = jax.random.PRNGKey(0)

    # (B, C, forced block_rows, question_loss_weight):
    #   - lane-aligned C, single block
    #   - ragged C, single block
    #   - ragged C + ragged B with a tiny forced block: multi-core grid,
    #     partial boundary block and clamped phantom block (mask path)
    #   - even B, ragged C, multi-step accumulation with no masking
    cases = [
        (16, 128, None, 1.0),
        (16, 24, None, 1.0),
        (37, 200, 8, 0.5),
        (64, 136, 16, 1.0),
    ]

    for (B, C, br, qlw) in cases:
        key, kq, kr, kl = jax.random.split(key, 4)
        logits_q = jax.random.normal(kq, (B, C), dtype=jnp.float32)
        logits_rubi = jax.random.normal(kr, (B, C), dtype=jnp.float32)
        # Multi-hot-style targets in [0, 1] (BCE targets).
        labels = (jax.random.uniform(kl, (B, C)) > 0.8).astype(jnp.float32)
        net_out = {"logits_q": logits_q, "logits_rubi": logits_rubi}

        out = rubi_criterion(net_out, labels, qlw,
                             use_pallas=True, block_rows=br)  # force Pallas
        out = jax.tree_util.tree_map(jax.block_until_ready, out)

        ref = _reference(net_out, labels, qlw)
        for k in ("loss", "loss_rubi", "loss_q"):
            assert jnp.allclose(out[k], ref[k], rtol=1e-4, atol=1e-4), (
                f"({B},{C},{br}) {k}: {out[k]} vs {ref[k]}")

    print("KERNEL_OK")
</pallas_src>

<mosaic_0001>
module attributes {stable_mosaic.version = 11 : i64} {
  func.func @kernel(%arg0: i32, %arg1: i32, %arg2: memref<16x128xf32, #tpu.memory_space<vmem>>, %arg3: memref<16x128xf32, #tpu.memory_space<vmem>>, %arg4: memref<16x128xf32, #tpu.memory_space<vmem>>, %arg5: memref<1x1x128xf32, #tpu.memory_space<vmem>>, %arg6: memref<1x1x128xf32, #tpu.memory_space<vmem>>) attributes {dimension_semantics = [#tpu.dimension_semantics<parallel>, #tpu.dimension_semantics<arbitrary>], iteration_bounds = array<i64: 1, 1>, scalar_prefetch = 0 : i64, scratch_operands = 0 : i64, tpu.core_type = #tpu.core_type<tc>, window_params = [{transform_indices = @transform_0, window_bounds = array<i64: 16, 128>}, {transform_indices = @transform_1, window_bounds = array<i64: 16, 128>}, {transform_indices = @transform_2, window_bounds = array<i64: 16, 128>}, {transform_indices = @transform_3, window_bounds = array<i64: 1, 1, 128>}, {transform_indices = @transform_4, window_bounds = array<i64: 1, 1, 128>}]} {
    %c0_i32 = arith.constant 0 : i32
    %0 = arith.cmpi eq, %arg1, %c0_i32 : i32
    %1 = arith.extui %0 : i1 to i32
    %c0_i32_0 = arith.constant 0 : i32
    %2 = arith.cmpi ne, %1, %c0_i32_0 : i32
    scf.if %2 {
      %cst_23 = arith.constant 0.000000e+00 : f32
      %38 = vector.broadcast %cst_23 : f32 to vector<1x1x128xf32>
      %c0_24 = arith.constant 0 : index
      %c0_25 = arith.constant 0 : index
      %c0_26 = arith.constant 0 : index
      %39 = vector.load %arg5[%c0_24, %c0_25, %c0_26] : memref<1x1x128xf32, #tpu.memory_space<vmem>>, vector<1x1x128xf32>
      tpu.vector_store %arg5[%c0_24, %c0_25, %c0_26], %38 {strides = array<i32>} : memref<1x1x128xf32, #tpu.memory_space<vmem>>, vector<1x1x128xf32>,
      %cst_27 = arith.constant 0.000000e+00 : f32
      %40 = vector.broadcast %cst_27 : f32 to vector<1x1x128xf32>
      %c0_28 = arith.constant 0 : index
      %c0_29 = arith.constant 0 : index
      %c0_30 = arith.constant 0 : index
      %41 = vector.load %arg6[%c0_28, %c0_29, %c0_30] : memref<1x1x128xf32, #tpu.memory_space<vmem>>, vector<1x1x128xf32>
      tpu.vector_store %arg6[%c0_28, %c0_29, %c0_30], %40 {strides = array<i32>} : memref<1x1x128xf32, #tpu.memory_space<vmem>>, vector<1x1x128xf32>,
    } else {
    }
    %c0 = arith.constant 0 : index
    %c0_1 = arith.constant 0 : index
    %3 = vector.load %arg4[%c0, %c0_1] : memref<16x128xf32, #tpu.memory_space<vmem>>, vector<16x128xf32>
    %c0_2 = arith.constant 0 : index
    %c0_3 = arith.constant 0 : index
    %c0_4 = arith.constant 0 : index
    %4 = vector.load %arg5[%c0_2, %c0_3, %c0_4] : memref<1x1x128xf32, #tpu.memory_space<vmem>>, vector<1x1x128xf32>
    %c0_5 = arith.constant 0 : index
    %c0_6 = arith.constant 0 : index
    %5 = vector.load %arg2[%c0_5, %c0_6] : memref<16x128xf32, #tpu.memory_space<vmem>>, vector<16x128xf32>
    %cst = arith.constant 0.000000e+00 : f32
    %6 = vector.broadcast %cst : f32 to vector<16x128xf32>
    %7 = arith.maximumf %5, %6 : vector<16x128xf32>
    %8 = arith.mulf %5, %3 : vector<16x128xf32>
    %9 = arith.subf %7, %8 : vector<16x128xf32>
    %10 = math.absf %5 : vector<16x128xf32>
    %cst_7 = arith.constant 0.000000e+00 : f32
    %11 = vector.broadcast %cst_7 : f32 to vector<16x128xf32>
    %12 = arith.subf %11, %10 : vector<16x128xf32>
    %13 = math.exp %12 : vector<16x128xf32>
    %14 = math.log1p %13 : vector<16x128xf32>
    %15 = arith.addf %9, %14 : vector<16x128xf32>
    %cst_8 = arith.constant dense<0.000000e+00> : vector<128xf32>
    %16 = vector.multi_reduction <add>, %15, %cst_8 [0] : vector<16x128xf32> to vector<128xf32>
    %17 = vector.shape_cast %16 : vector<128xf32> to vector<1x128xf32>
    %18 = vector.shape_cast %17 : vector<1x128xf32> to vector<1x1x128xf32>
    %19 = arith.addf %4, %18 : vector<1x1x128xf32>
    %c0_9 = arith.constant 0 : index
    %c0_10 = arith.constant 0 : index
    %c0_11 = arith.constant 0 : index
    %20 = vector.load %arg5[%c0_9, %c0_10, %c0_11] : memref<1x1x128xf32, #tpu.memory_space<vmem>>, vector<1x1x128xf32>
    tpu.vector_store %arg5[%c0_9, %c0_10, %c0_11], %19 {strides = array<i32>} : memref<1x1x128xf32, #tpu.memory_space<vmem>>, vector<1x1x128xf32>,
    %c0_12 = arith.constant 0 : index
    %c0_13 = arith.constant 0 : index
    %c0_14 = arith.constant 0 : index
    %21 = vector.load %arg6[%c0_12, %c0_13, %c0_14] : memref<1x1x128xf32, #tpu.memory_space<vmem>>, vector<1x1x128xf32>
    %c0_15 = arith.constant 0 : index
    %c0_16 = arith.constant 0 : index
    %22 = vector.load %arg3[%c0_15, %c0_16] : memref<16x128xf32, #tpu.memory_space<vmem>>, vector<16x128xf32>
    %cst_17 = arith.constant 0.000000e+00 : f32
    %23 = vector.broadcast %cst_17 : f32 to vector<16x128xf32>
    %24 = arith.maximumf %22, %23 : vector<16x128xf32>
    %25 = arith.mulf %22, %3 : vector<16x128xf32>
    %26 = arith.subf %24, %25 : vector<16x128xf32>
    %27 = math.absf %22 : vector<16x128xf32>
    %cst_18 = arith.constant 0.000000e+00 : f32
    %28 = vector.broadcast %cst_18 : f32 to vector<16x128xf32>
    %29 = arith.subf %28, %27 : vector<16x128xf32>
    %30 = math.exp %29 : vector<16x128xf32>
    %31 = math.log1p %30 : vector<16x128xf32>
    %32 = arith.addf %26, %31 : vector<16x128xf32>
    %cst_19 = arith.constant dense<0.000000e+00> : vector<128xf32>
    %33 = vector.multi_reduction <add>, %32, %cst_19 [0] : vector<16x128xf32> to vector<128xf32>
    %34 = vector.shape_cast %33 : vector<128xf32> to vector<1x128xf32>
    %35 = vector.shape_cast %34 : vector<1x128xf32> to vector<1x1x128xf32>
    %36 = arith.addf %21, %35 : vector<1x1x128xf32>
    %c0_20 = arith.constant 0 : index
    %c0_21 = arith.constant 0 : index
    %c0_22 = arith.constant 0 : index
    %37 = vector.load %arg6[%c0_20, %c0_21, %c0_22] : memref<1x1x128xf32, #tpu.memory_space<vmem>>, vector<1x1x128xf32>
    tpu.vector_store %arg6[%c0_20, %c0_21, %c0_22], %36 {strides = array<i32>} : memref<1x1x128xf32, #tpu.memory_space<vmem>>, vector<1x1x128xf32>,
    return
  }
  func.func @transform_0(%arg0: i32, %arg1: i32) -> (i32, i32) {
    %c1_i32 = arith.constant 1 : i32
    %0 = arith.muli %arg0, %c1_i32 : i32
    %1 = arith.addi %0, %arg1 : i32
    %c0_i32 = arith.constant 0 : i32
    %2 = arith.minsi %1, %c0_i32 : i32
    %c0_i32_0 = arith.constant 0 : i32
    %c0_i32_1 = arith.constant 0 : i32
    return %2, %c0_i32_0 : i32, i32
  }
  func.func @transform_1(%arg0: i32, %arg1: i32) -> (i32, i32) {
    %c1_i32 = arith.constant 1 : i32
    %0 = arith.muli %arg0, %c1_i32 : i32
    %1 = arith.addi %0, %arg1 : i32
    %c0_i32 = arith.constant 0 : i32
    %2 = arith.minsi %1, %c0_i32 : i32
    %c0_i32_0 = arith.constant 0 : i32
    %c0_i32_1 = arith.constant 0 : i32
    return %2, %c0_i32_0 : i32, i32
  }
  func.func @transform_2(%arg0: i32, %arg1: i32) -> (i32, i32) {
    %c1_i32 = arith.constant 1 : i32
    %0 = arith.muli %arg0, %c1_i32 : i32
    %1 = arith.addi %0, %arg1 : i32
    %c0_i32 = arith.constant 0 : i32
    %2 = arith.minsi %1, %c0_i32 : i32
    %c0_i32_0 = arith.constant 0 : i32
    %c0_i32_1 = arith.constant 0 : i32
    return %2, %c0_i32_0 : i32, i32
  }
  func.func @transform_3(%arg0: i32, %arg1: i32) -> (i32, i32, i32) {
    %c0_i32 = arith.constant 0 : i32
    %c0_i32_0 = arith.constant 0 : i32
    %c0_i32_1 = arith.constant 0 : i32
    return %arg0, %c0_i32, %c0_i32_0 : i32, i32, i32
  }
  func.func @transform_4(%arg0: i32, %arg1: i32) -> (i32, i32, i32) {
    %c0_i32 = arith.constant 0 : i32
    %c0_i32_0 = arith.constant 0 : i32
    %c0_i32_1 = arith.constant 0 : i32
    return %arg0, %c0_i32, %c0_i32_0 : i32, i32, i32
  }
}

</mosaic_0001>

<bundles_post_ra>
// kernel: tpu_custom_call.1
= control target key start
LH: loop header
LB: loop body
LE: loop exit
PB: predicated region body
PF: predicated region fallthrough
CT: control target
= control target key end

     0   :  { %10 = vsyncpa [#allocation3], 0  ;;  %s440_s0 = inlined_call_operand.hbm [shape: f32[16,128], index: 0, kind: input, shape index: {}]   ;;  %s441_s1 = inlined_call_operand.hbm [shape: f32[16,128], index: 1, kind: input, shape index: {}]   ;;  %s442_s2 = inlined_call_operand.hbm [shape: f32[16,128], index: 2, kind: input, shape index: {}]   ;;  %s443_s3 = inlined_call_operand.hbm [shape: f32[1,1,128], index: 3, kind: output, shape index: {0}]   ;;  %s444_s4 = inlined_call_operand.hbm [shape: f32[1,1,128], index: 4, kind: output, shape index: {1}]  }
   0x1   :  { %11 = vsyncpa [#allocation6], 0 }
   0x2   :  { %12 = vsyncpa [#allocation4], 0 }
   0x3   :  { %13 = vsyncpa [#allocation10], 0  ;;  %s43_s17 = sshll.u32 %s441_s1, 4  ;;  %s387_s18 = smov [#allocation5]   ;;  %s44_s17 = int_to_ptr.hbm [resolvable:$true] %s43_s17 }
   0x4   :  { %s45_s19 = sshll.u32 %s387_s18, 4  ;;  %s24_s22 = sshll.u32 %s440_s0, 4  ;;  %s46_s19 = int_to_ptr.vmem [resolvable:$true] %s45_s19  ;;  %s25_s22 = int_to_ptr.hbm [resolvable:$true] %s24_s22 }
   0x5   :  { %s388_s23 = smov 128   ;;  %s389_s24 = smov 8  }
   0x6   :  { %51 = dma.hbm_to_vmem [thread:$0]  %s44_s17, 256, %s46_s19, [#allocation6], %s388_s23, %s388_s23, %s389_s24  }
   0x7   :  { %s390_s25 = smov [#allocation2]   ;;  %s62_s29 = sshll.u32 %s442_s2, 4  ;;  %s63_s29 = int_to_ptr.hbm [resolvable:$true] %s62_s29 }
   0x8   :  { %s26_s26 = sshll.u32 %s390_s25, 4  ;;  %s391_s1 = smov [#allocation7]   ;;  %s27_s26 = int_to_ptr.vmem [resolvable:$true] %s26_s26 }
   0x9   :  { %32 = dma.hbm_to_vmem [thread:$0]  %s25_s22, 256, %s27_s26, [#allocation3], %s388_s23, %s388_s23, %s389_s24  }
   0xa   :  { %s64_s30 = sshll.u32 %s391_s1, 4  ;;  %s65_s30 = int_to_ptr.vmem [resolvable:$true] %s64_s30 }
   0xb   :  { %70 = dma.hbm_to_vmem [thread:$0]  %s63_s29, 256, %s65_s30, [#allocation6], %s388_s23, %s388_s23, %s389_s24  }
   0xc   :  { %379 = dma.done.wait [#allocation3], 256  }
   0xd   :  { %380 = vsyncadd [#allocation3], 4294967040 }
   0xe   :  { %381 = dma.done.wait [#allocation6], 512  }
   0xf   :  { %382 = vsyncadd [#allocation6], 4294966784  ;;  %v392_v0 = vmov 0.0   ;;  %v104_v1 = vld [vmem:[#allocation2] sm:$0xff]  ;;  %v105_v2 = vld [vmem:[#allocation2 + $0x8] sm:$0xff]  ;;  %s393_s0 = smov [#allocation8]  }
  0x10   :  { %99 = vst [vmem:[#allocation8] sm:$0x1] %v392_v0  ;;  %v112_v3 = vand.u32 2147483647, %v104_v1  ;;  %v113_v4 = vand.u32 2147483647, %v105_v2 }
  0x11   :  { %100 = vst [vmem:[#allocation9] sm:$0x1] %v392_v0  ;;  %v150_v5 = vld [vmem:[#allocation5] sm:$0xff]  ;;  %v429_v6 = vld [vmem:[#allocation5 + $0x8] sm:$0xff]  ;;  %v101_v17 = vld [vmem:[#allocation7] sm:$0xff]  ;;  %v106_v23 = vmax.f32 %v104_v1, 0.0 }
  0x12   :  { %v114_v7 = vsub.f32 0.0, %v112_v3  ;;  %v115_v8 = vsub.f32 0.0, %v113_v4  ;;  %v158_v10 = vand.u32 2147483647, %v150_v5  ;;  %v159_v11 = vand.u32 2147483647, %v429_v6 }
  0x13   :  { %v102_v19 = vld [vmem:[#allocation7 + $0x8] sm:$0xff]  ;;  %v108_v24 = vmul.f32 %v104_v1, %v101_v17  ;;  %v107_v27 = vmax.f32 %v105_v2, 0.0  ;;  %v152_v41 = vmax.f32 %v150_v5, 0.0  ;;  %v153_v42 = vmax.f32 %v429_v6, 0.0  ;;  %s200_s2 = sshll.u32 %s393_s0, 4  ;;  %s202_s7 = sshll.u32 %s443_s3, 4  ;;  %s201_s2 = int_to_ptr.vmem [resolvable:$true] %s200_s2  ;;  %s203_s7 = int_to_ptr.hbm [resolvable:$true] %s202_s7 }
  0x14   :  { %v116_v9 = vmul.f32 1.442695, %v114_v7  ;;  %v118_v12 = vmul.f32 1.442695, %v115_v8  ;;  %v160_v13 = vsub.f32 0.0, %v158_v10  ;;  %v161_v14 = vsub.f32 0.0, %v159_v11 }
  0x15   :  { %v109_v28 = vmul.f32 %v105_v2, %v102_v19  ;;  %v110_v36 = vsub.f32 %v106_v23, %v108_v24  ;;  %v154_v44 = vmul.f32 %v150_v5, %v101_v17  ;;  %v155_v52 = vmul.f32 %v429_v6, %v102_v19  ;;  %s394_s8 = smov [#allocation9]   ;;  %s213_s12 = sshll.u32 %s444_s4, 4  ;;  %s214_s12 = int_to_ptr.hbm [resolvable:$true] %s213_s12 }
  0x16   :  { %243 = vpow2.f32 %v116_v9  ;;  %v162_v15 = vmul.f32 1.442695, %v160_v13  ;;  %v164_v16 = vmul.f32 1.442695, %v161_v14  ;;  %s211_s9 = sshll.u32 %s394_s8, 4  ;;  %s212_s9 = int_to_ptr.vmem [resolvable:$true] %s211_s9 }
  0x17   :  { %245 = vpow2.f32 %v118_v12  ;;  %v111_v40 = vsub.f32 %v107_v27, %v109_v28  ;;  %v156_v56 = vsub.f32 %v152_v41, %v154_v44  ;;  %v157_v0 = vsub.f32 %v153_v42, %v155_v52  ;;  %v103_v17 = vld [vmem:[#allocation8] sm:$0x1] }
  0x18   :  { %247 = vpow2.f32 %v162_v15 }
  0x19   :  { %249 = vpow2.f32 %v164_v16 }
  0x1c   :  { %v244_v18 = vpop.eup %243 }
  0x1d   :  { %v246_v20 = vpop.eup %245  ;;  %v120_v21 = vadd.f32 1.0, %v244_v18  ;;  %v123_v22 = vmul.f32 -0.5, %v244_v18  ;;  %v126_v32 = vand.u32 2147483647, %v244_v18 }
  0x1e   :  { %v129_v25 = vadd.f32 1.0, %v246_v20  ;;  %v132_v26 = vmul.f32 -0.5, %v246_v20  ;;  %v248_v29 = vpop.eup %247  ;;  %v135_v37 = vand.u32 2147483647, %v246_v20 }
  0x1f   :  { %251 = vlog2.f32 %v120_v21  ;;  %v124_v30 = vadd.f32 1.0, %v123_v22  ;;  %v250_v31 = vpop.eup %249  ;;  %v166_v34 = vadd.f32 1.0, %v248_v29  ;;  %v169_v35 = vmul.f32 -0.5, %v248_v29  ;;  %v149_v22 = vld [vmem:[#allocation9] sm:$0x1] }
  0x20   :  { %253 = vlog2.f32 %v129_v25  ;;  %v133_v33 = vadd.f32 1.0, %v132_v26  ;;  %v175_v38 = vadd.f32 1.0, %v250_v31  ;;  %v178_v39 = vmul.f32 -0.5, %v250_v31 }
  0x21   :  { %255 = vlog2.f32 %v166_v34  ;;  %v125_v43 = vmul.f32 %v244_v18, %v124_v30  ;;  %v170_v45 = vadd.f32 1.0, %v169_v35  ;;  %vm127_vm0 = vcmp.lt.f32.partialorder %v126_v32, 0.0004427343 }
  0x22   :  { %257 = vlog2.f32 %v175_v38  ;;  %v134_v47 = vmul.f32 %v246_v20, %v133_v33  ;;  %v172_v48 = vand.u32 2147483647, %v248_v29  ;;  %v179_v49 = vadd.f32 1.0, %v178_v39 }
  0x23   :  { %vm136_vm1 = vcmp.lt.f32.partialorder %v135_v37, 0.0004427343  ;;  %v181_v53 = vand.u32 2147483647, %v250_v31  ;;  %v171_v57 = vmul.f32 %v248_v29, %v170_v45 }
  0x24   :  { %vm173_vm2 = vcmp.lt.f32.partialorder %v172_v48, 0.0004427343  ;;  %v180_v61 = vmul.f32 %v250_v31, %v179_v49 }
  0x25   :  { %v252_v46 = vpop.eup %251  ;;  %vm182_vm3 = vcmp.lt.f32.partialorder %v181_v53, 0.0004427343 }
  0x26   :  { %v254_v50 = vpop.eup %253  ;;  %v122_v51 = vmul.f32 0.6931472, %v252_v46 }
  0x27   :  { %v131_v54 = vmul.f32 0.6931472, %v254_v50  ;;  %v256_v58 = vpop.eup %255 }
  0x28   :  { %v128_v55 = vsel %vm127_vm0, %v125_v43, %v122_v51  ;;  %v258_v62 = vpop.eup %257  ;;  %v168_v1 = vmul.f32 0.6931472, %v256_v58 }
  0x29   :  { %v137_v59 = vsel %vm136_vm1, %v134_v47, %v131_v54  ;;  %v138_v60 = vadd.f32 %v128_v55, %v110_v36  ;;  %v177_v2 = vmul.f32 0.6931472, %v258_v62 }
  0x2a   :  { %v139_v63 = vadd.f32 %v137_v59, %v111_v40  ;;  %v174_v4 = vsel %vm173_vm2, %v171_v57, %v168_v1 }
  0x2b   :  { %v183_v5 = vsel %vm182_vm3, %v180_v61, %v177_v2  ;;  %v184_v6 = vadd.f32 %v174_v4, %v156_v56 }
  0x2c   :  { %v140_v3 = vadd.f32 %v139_v63, %v138_v60  ;;  %v185_v8 = vadd.f32 %v183_v5, %v157_v0 }
  0x2e   :  { %v141_v7 = vrot.slane %v140_v3, 4  ;;  %v186_v10 = vadd.f32 %v185_v8, %v184_v6 }
  0x30   :  { %v142_v9 = vadd.f32 %v141_v7, %v140_v3  ;;  %v187_v12 = vrot.slane %v186_v10, 4 }
  0x32   :  { %v143_v11 = vrot.slane %v142_v9, 2  ;;  %v188_v14 = vadd.f32 %v187_v12, %v186_v10 }
  0x34   :  { %v144_v13 = vadd.f32 %v143_v11, %v142_v9  ;;  %v189_v16 = vrot.slane %v188_v14, 2 }
  0x36   :  { %v145_v15 = vrot.slane %v144_v13, 1  ;;  %v190_v19 = vadd.f32 %v189_v16, %v188_v14 }
  0x38   :  { %v146_v18 = vadd.f32 %v145_v15, %v144_v13  ;;  %v191_v21 = vrot.slane %v190_v19, 1 }
  0x3a   :  { %v147_v20 = vadd.f32 %v146_v18, %v103_v17  ;;  %v192_v23 = vadd.f32 %v191_v21, %v190_v19 }
  0x3c   :  { %148 = vst [vmem:[#allocation8] sm:$0x1] %v147_v20  ;;  %v193_v24 = vadd.f32 %v192_v23, %v149_v22 }
  0x3d   :  { %205 = dma.vmem_to_hbm [thread:$0]  %s201_s2, 16, %s203_s7, [#allocation4]  }
  0x3e   :  { %194 = vst [vmem:[#allocation9] sm:$0x1] %v193_v24 }
  0x3f   :  { %216 = dma.vmem_to_hbm [thread:$0]  %s212_s9, 16, %s214_s12, [#allocation10]  }
  0x40   :  { %383 = dma.done.wait [#allocation4], 16  }
  0x41   :  { %384 = vsyncadd [#allocation4], 4294967280 }
  0x42   :  { %385 = dma.done.wait [#allocation10], 16  }
  0x43   :  { %386 = vsyncadd [#allocation10], 4294967280 }
  0x44   :  { %225 = vsyncpa [#allocation3], 1 }
  0x45   :  { %226 = vsyncpa [#allocation6], 1 }
  0x46   :  { %227 = vsyncpa [#allocation4], 1 }
  0x47   :  { %228 = vsyncpa [#allocation10], 1 }

</bundles_post_ra>
